<compile_context>
chip_gen: v6e
topology: v6e:2x2x1
jax: 0.10.0
libtpu: 0.0.40
codegen_flags: <defaults>
</compile_context>

<pallas_src>
import jax
import jax.numpy as jnp
from jax.experimental import pallas as pl
from jax.experimental.pallas import tpu as pltpu


def _entnet_updater_kernel(ents_ref, keys_ref, dist_ref, oc_ref, rsel_ref,
                           wv_ref, wk_ref, a_ref, s_ref, g_ref, out_ref):
    ents_in = ents_ref[...]                       # (blk, L)  operand dtype
    keys_in = keys_ref[...]                       # (blk, L)
    ents = ents_in.astype(jnp.float32)            # f32 copy for the gating path

    # oe + ok : two lane-dense MXU passes against block-diagonal weights.
    pre = jnp.dot(ents_in, wv_ref[...], preferred_element_type=jnp.float32)
    pre = pre + jnp.dot(keys_in, wk_ref[...], preferred_element_type=jnp.float32)

    # + oc : broadcast each batch's oc row over its packed rows via a tiny
    # selector matmul (no in-kernel reshapes/repeats -> robust lowering).
    pre = pre + jnp.dot(rsel_ref[...], oc_ref[...],
                        preferred_element_type=jnp.float32)

    # PReLU with per-channel weight (tiled P times along the 128 lanes).
    a = a_ref[...]
    act = jnp.where(pre >= 0.0, pre, a * pre)

    # Spread dist over each logical row's E-lane group.
    nd = jnp.dot(dist_ref[...], s_ref[...], preferred_element_type=jnp.float32)

    # Gated update:  ents + nd*(act - ents)  ==  nd*act + (1-nd)*ents
    new_ents = ents + nd * (act - ents)

    # Per-logical-row (per lane-group) L2 normalization: group-sum via matmul,
    # then rsqrt (EUP) and scale.
    sumsq = jnp.dot(new_ents * new_ents, g_ref[...],
                    preferred_element_type=jnp.float32)
    out_ref[...] = new_ents * jax.lax.rsqrt(sumsq)


def entnet_entity_updater(entities, new_entities, dist, keys, ctx,
                          wk, wv, wc, prelu_weight, *,
                          operand_dtype=jnp.float32):
    """entities/keys: (B, N, E); new_entities: (B, E) [unused]; dist: (B, N);
    ctx: (B, H).  wk, wv: (E, E) PyTorch Linear weights (out, in); wc: (E, H);
    prelu_weight: (E,).  Returns (normalized new entities (B,N,E), n_dist (B,N,E))."""
    del new_entities  # unused by the reference forward()
    B, N, E = entities.shape
    f32 = jnp.float32
    R = B * N

    # ---- lane packing: P logical rows per 128-lane row (free view) ----------
    if E <= 128 and 128 % E == 0 and N % (128 // E) == 0:
        P = 128 // E
    else:
        P = 1
    L = P * E                      # lane width of the packed layout
    npb = N // P                   # packed rows per batch
    packed_rows = R // P

    # ---- block selection: whole batches per block, no padding ---------------
    # bpb = batches per block; blocks must satisfy the (8,128)/full-dim rule on
    # both the packed-row arrays (blk sublanes) and the oc array (bpb sublanes).
    candidates = []
    for d in range(1, B + 1):
        if B % d:
            continue
        blk_d = d * npb
        if (blk_d % 8 == 0 or blk_d == packed_rows) and (d % 8 == 0 or d == B):
            candidates.append(d)
    multi = [d for d in candidates if (B // d) >= 2 and d * npb <= 1024]
    pool = multi if multi else candidates          # prefer >=2 blocks (v7x megacore)
    bpb = max(pool, key=lambda d: (min(d * npb, 512), -(d * npb)))
    blk = bpb * npb
    nb = B // bpb

    # ---- wrapper-side precomputes (all tiny; no (R, ...) materialization) ---
    ents_p = entities.reshape(packed_rows, L).astype(operand_dtype)   # free view
    keys_p = keys.reshape(packed_rows, L).astype(operand_dtype)       # free view
    dist_p = dist.reshape(packed_rows, P).astype(f32)                 # free view
    oc = ctx.astype(f32) @ wc.astype(f32).T                           # (B, E)
    oc_rep = jnp.tile(oc, (1, P))                                     # (B, L)
    eye_p = jnp.eye(P, dtype=f32)
    wv_bd = jnp.kron(eye_p, wv.astype(f32).T).astype(operand_dtype)   # (L, L)
    wk_bd = jnp.kron(eye_p, wk.astype(f32).T).astype(operand_dtype)   # (L, L)
    a_rep = jnp.tile(prelu_weight.astype(f32).reshape(1, E), (1, P))  # (1, L)
    s_mat = jnp.kron(eye_p, jnp.ones((1, E), f32))                    # (P, L)
    g_mat = jnp.kron(eye_p, jnp.ones((E, E), f32))                    # (L, L)
    rsel = jnp.kron(jnp.eye(bpb, dtype=f32), jnp.ones((npb, 1), f32)) # (blk, bpb)

    out = pl.pallas_call(
        _entnet_updater_kernel,
        out_shape=jax.ShapeDtypeStruct((packed_rows, L), f32),
        grid_spec=pltpu.PrefetchScalarGridSpec(
            num_scalar_prefetch=0,
            grid=(nb,),
            in_specs=[
                pl.BlockSpec((blk, L), lambda i: (i, 0)),     # entities (packed)
                pl.BlockSpec((blk, L), lambda i: (i, 0)),     # keys     (packed)
                pl.BlockSpec((blk, P), lambda i: (i, 0)),     # dist     (packed)
                pl.BlockSpec((bpb, L), lambda i: (i, 0)),     # oc, per-batch rows
                pl.BlockSpec((blk, bpb), lambda i: (0, 0)),   # row selector (resident)
                pl.BlockSpec((L, L), lambda i: (0, 0)),       # blockdiag(Wv^T) (resident)
                pl.BlockSpec((L, L), lambda i: (0, 0)),       # blockdiag(Wk^T) (resident)
                pl.BlockSpec((1, L), lambda i: (0, 0)),       # PReLU weight (resident)
                pl.BlockSpec((P, L), lambda i: (0, 0)),       # dist-spread matrix (resident)
                pl.BlockSpec((L, L), lambda i: (0, 0)),       # group-sum matrix (resident)
            ],
            out_specs=pl.BlockSpec((blk, L), lambda i: (i, 0)),
        ),
        compiler_params=pltpu.CompilerParams(
            dimension_semantics=("parallel",)),
    )(ents_p, keys_p, dist_p, oc_rep, rsel, wv_bd, wk_bd, a_rep, s_mat, g_mat)

    out_ents = out.reshape(B, N, E)                # free view back
    # Returned only to match the module's signature; consumers that just need
    # the per-row gate should use `dist` directly (saves R*E*4 B HBM writeback).
    n_dist = jnp.broadcast_to(dist.astype(f32).reshape(B, N, 1), (B, N, E))
    return out_ents, n_dist


def _reference(entities, dist, keys, ctx, wk, wv, wc, prelu_weight):
    B, N, E = entities.shape
    ok = keys @ wk.T
    oe = entities @ wv.T
    oc = (ctx @ wc.T)[:, None, :]
    pre = ok + oe + oc
    act = jnp.where(pre >= 0, pre, prelu_weight[None, None, :] * pre)
    nd = dist[:, :, None]
    new_ents = nd * act + (1.0 - nd) * entities
    norm = jnp.linalg.norm(new_ents, axis=2, keepdims=True)
    return new_ents * (1.0 / norm), jnp.broadcast_to(nd, (B, N, E))


if __name__ == "__main__":
    B, N, E, H = 2, 8, 32, 32  # batch, num_entities, eSize, hSize

    key = jax.random.PRNGKey(0)
    ks = jax.random.split(key, 8)
    entities = jax.random.normal(ks[0], (B, N, E), jnp.float32)
    new_entities = jax.random.normal(ks[1], (B, E), jnp.float32)  # unused by forward()
    dist = jax.nn.softmax(jax.random.normal(ks[2], (B, N), jnp.float32), axis=-1)
    keys_t = jax.random.normal(ks[3], (B, N, E), jnp.float32)
    ctx = jax.random.normal(ks[4], (B, H), jnp.float32)

    # Deterministic params (Linear weights are (out, in), no bias; PReLU weight = 1).
    wk = jax.random.normal(ks[5], (E, E), jnp.float32) * 0.1
    wv = jax.random.normal(ks[6], (E, E), jnp.float32) * 0.1
    wc = jax.random.normal(ks[7], (E, H), jnp.float32) * 0.1
    prelu_weight = jnp.ones((E,), jnp.float32)

    out_ents, n_dist = entnet_entity_updater(
        entities, new_entities, dist, keys_t, ctx, wk, wv, wc, prelu_weight)
    jax.block_until_ready(out_ents)
    jax.block_until_ready(n_dist)

    ref_ents, ref_nd = _reference(entities, dist, keys_t, ctx, wk, wv, wc, prelu_weight)
    assert jnp.allclose(out_ents, ref_ents, atol=1e-5, rtol=1e-5)
    assert jnp.allclose(n_dist, ref_nd, atol=1e-6, rtol=1e-6)
    print("KERNEL_OK")
</pallas_src>

<mosaic_0001>
module attributes {stable_mosaic.version = 11 : i64} {
  func.func @_entnet_updater_kernel(%arg0: i32, %arg1: memref<4x128xf32, #tpu.memory_space<vmem>>, %arg2: memref<4x128xf32, #tpu.memory_space<vmem>>, %arg3: memref<4x4xf32, #tpu.memory_space<vmem>>, %arg4: memref<2x128xf32, #tpu.memory_space<vmem>>, %arg5: memref<4x2xf32, #tpu.memory_space<vmem>>, %arg6: memref<128x128xf32, #tpu.memory_space<vmem>>, %arg7: memref<128x128xf32, #tpu.memory_space<vmem>>, %arg8: memref<1x128xf32, #tpu.memory_space<vmem>>, %arg9: memref<4x128xf32, #tpu.memory_space<vmem>>, %arg10: memref<128x128xf32, #tpu.memory_space<vmem>>, %arg11: memref<4x128xf32, #tpu.memory_space<vmem>>) attributes {dimension_semantics = [#tpu.dimension_semantics<parallel>], iteration_bounds = array<i64: 1>, scalar_prefetch = 0 : i64, scratch_operands = 0 : i64, tpu.core_type = #tpu.core_type<tc>, window_params = [{transform_indices = @transform_0, window_bounds = array<i64: 4, 128>}, {transform_indices = @transform_1, window_bounds = array<i64: 4, 128>}, {transform_indices = @transform_2, window_bounds = array<i64: 4, 4>}, {transform_indices = @transform_3, window_bounds = array<i64: 2, 128>}, {pipeline_mode = #tpu.pipeline_mode<synchronous>, transform_indices = @transform_4, window_bounds = array<i64: 4, 2>}, {pipeline_mode = #tpu.pipeline_mode<synchronous>, transform_indices = @transform_5, window_bounds = array<i64: 128, 128>}, {pipeline_mode = #tpu.pipeline_mode<synchronous>, transform_indices = @transform_6, window_bounds = array<i64: 128, 128>}, {pipeline_mode = #tpu.pipeline_mode<synchronous>, transform_indices = @transform_7, window_bounds = array<i64: 1, 128>}, {pipeline_mode = #tpu.pipeline_mode<synchronous>, transform_indices = @transform_8, window_bounds = array<i64: 4, 128>}, {pipeline_mode = #tpu.pipeline_mode<synchronous>, transform_indices = @transform_9, window_bounds = array<i64: 128, 128>}, {transform_indices = @transform_10, window_bounds = array<i64: 4, 128>}]} {
    %c0 = arith.constant 0 : index
    %c0_0 = arith.constant 0 : index
    %0 = vector.load %arg1[%c0, %c0_0] : memref<4x128xf32, #tpu.memory_space<vmem>>, vector<4x128xf32>
    %c0_1 = arith.constant 0 : index
    %c0_2 = arith.constant 0 : index
    %1 = vector.load %arg2[%c0_1, %c0_2] : memref<4x128xf32, #tpu.memory_space<vmem>>, vector<4x128xf32>
    %c0_3 = arith.constant 0 : index
    %c0_4 = arith.constant 0 : index
    %2 = vector.load %arg6[%c0_3, %c0_4] : memref<128x128xf32, #tpu.memory_space<vmem>>, vector<128x128xf32>
    %cst = arith.constant dense<0.000000e+00> : vector<4x128xf32>
    %3 = tpu.matmul %0, %2, %cst {dimension_numbers = #tpu.dot_dimension_numbers<[1], [0], [0], [1], [0, 0, 1, 1], [], []>} : vector<4x128xf32>, vector<128x128xf32>, vector<4x128xf32> -> vector<4x128xf32>
    %c0_5 = arith.constant 0 : index
    %c0_6 = arith.constant 0 : index
    %4 = vector.load %arg7[%c0_5, %c0_6] : memref<128x128xf32, #tpu.memory_space<vmem>>, vector<128x128xf32>
    %cst_7 = arith.constant dense<0.000000e+00> : vector<4x128xf32>
    %5 = tpu.matmul %1, %4, %cst_7 {dimension_numbers = #tpu.dot_dimension_numbers<[1], [0], [0], [1], [0, 0, 1, 1], [], []>} : vector<4x128xf32>, vector<128x128xf32>, vector<4x128xf32> -> vector<4x128xf32>
    %6 = arith.addf %3, %5 : vector<4x128xf32>
    %c0_8 = arith.constant 0 : index
    %c0_9 = arith.constant 0 : index
    %7 = vector.load %arg5[%c0_8, %c0_9] : memref<4x2xf32, #tpu.memory_space<vmem>>, vector<4x2xf32>
    %c0_10 = arith.constant 0 : index
    %c0_11 = arith.constant 0 : index
    %8 = vector.load %arg4[%c0_10, %c0_11] : memref<2x128xf32, #tpu.memory_space<vmem>>, vector<2x128xf32>
    %cst_12 = arith.constant dense<0.000000e+00> : vector<4x128xf32>
    %9 = tpu.matmul %7, %8, %cst_12 {dimension_numbers = #tpu.dot_dimension_numbers<[1], [0], [0], [1], [0, 0, 1, 1], [], []>} : vector<4x2xf32>, vector<2x128xf32>, vector<4x128xf32> -> vector<4x128xf32>
    %10 = arith.addf %6, %9 : vector<4x128xf32>
    %c0_13 = arith.constant 0 : index
    %c0_14 = arith.constant 0 : index
    %11 = vector.load %arg8[%c0_13, %c0_14] : memref<1x128xf32, #tpu.memory_space<vmem>>, vector<1x128xf32>
    %cst_15 = arith.constant 0.000000e+00 : f32
    %12 = vector.broadcast %cst_15 : f32 to vector<4x128xf32>
    %13 = arith.cmpf oge, %10, %12 : vector<4x128xf32>
    %14 = vector.broadcast %11 : vector<1x128xf32> to vector<4x128xf32>
    %15 = arith.mulf %14, %10 : vector<4x128xf32>
    %16 = arith.select %13, %10, %15 : vector<4x128xi1>, vector<4x128xf32>
    %c0_16 = arith.constant 0 : index
    %c0_17 = arith.constant 0 : index
    %17 = vector.load %arg3[%c0_16, %c0_17] : memref<4x4xf32, #tpu.memory_space<vmem>>, vector<4x4xf32>
    %c0_18 = arith.constant 0 : index
    %c0_19 = arith.constant 0 : index
    %18 = vector.load %arg9[%c0_18, %c0_19] : memref<4x128xf32, #tpu.memory_space<vmem>>, vector<4x128xf32>
    %cst_20 = arith.constant dense<0.000000e+00> : vector<4x128xf32>
    %19 = tpu.matmul %17, %18, %cst_20 {dimension_numbers = #tpu.dot_dimension_numbers<[1], [0], [0], [1], [0, 0, 1, 1], [], []>} : vector<4x4xf32>, vector<4x128xf32>, vector<4x128xf32> -> vector<4x128xf32>
    %20 = arith.subf %16, %0 : vector<4x128xf32>
    %21 = arith.mulf %19, %20 : vector<4x128xf32>
    %22 = arith.addf %0, %21 : vector<4x128xf32>
    %23 = arith.mulf %22, %22 : vector<4x128xf32>
    %c0_21 = arith.constant 0 : index
    %c0_22 = arith.constant 0 : index
    %24 = vector.load %arg10[%c0_21, %c0_22] : memref<128x128xf32, #tpu.memory_space<vmem>>, vector<128x128xf32>
    %cst_23 = arith.constant dense<0.000000e+00> : vector<4x128xf32>
    %25 = tpu.matmul %23, %24, %cst_23 {dimension_numbers = #tpu.dot_dimension_numbers<[1], [0], [0], [1], [0, 0, 1, 1], [], []>} : vector<4x128xf32>, vector<128x128xf32>, vector<4x128xf32> -> vector<4x128xf32>
    %26 = math.rsqrt %25 : vector<4x128xf32>
    %27 = arith.mulf %22, %26 : vector<4x128xf32>
    %c0_24 = arith.constant 0 : index
    %c0_25 = arith.constant 0 : index
    %28 = vector.load %arg11[%c0_24, %c0_25] : memref<4x128xf32, #tpu.memory_space<vmem>>, vector<4x128xf32>
    tpu.vector_store %arg11[%c0_24, %c0_25], %27 {strides = array<i32>} : memref<4x128xf32, #tpu.memory_space<vmem>>, vector<4x128xf32>,
    return
  }
  func.func @transform_0(%arg0: i32) -> (i32, i32) {
    %c0_i32 = arith.constant 0 : i32
    %c0_i32_0 = arith.constant 0 : i32
    return %arg0, %c0_i32 : i32, i32
  }
  func.func @transform_1(%arg0: i32) -> (i32, i32) {
    %c0_i32 = arith.constant 0 : i32
    %c0_i32_0 = arith.constant 0 : i32
    return %arg0, %c0_i32 : i32, i32
  }
  func.func @transform_2(%arg0: i32) -> (i32, i32) {
    %c0_i32 = arith.constant 0 : i32
    %c0_i32_0 = arith.constant 0 : i32
    return %arg0, %c0_i32 : i32, i32
  }
  func.func @transform_3(%arg0: i32) -> (i32, i32) {
    %c0_i32 = arith.constant 0 : i32
    %c0_i32_0 = arith.constant 0 : i32
    return %arg0, %c0_i32 : i32, i32
  }
  func.func @transform_4(%arg0: i32) -> (i32, i32) {
    %c0_i32 = arith.constant 0 : i32
    %c0_i32_0 = arith.constant 0 : i32
    %c0_i32_1 = arith.constant 0 : i32
    return %c0_i32, %c0_i32_0 : i32, i32
  }
  func.func @transform_5(%arg0: i32) -> (i32, i32) {
    %c0_i32 = arith.constant 0 : i32
    %c0_i32_0 = arith.constant 0 : i32
    %c0_i32_1 = arith.constant 0 : i32
    return %c0_i32, %c0_i32_0 : i32, i32
  }
  func.func @transform_6(%arg0: i32) -> (i32, i32) {
    %c0_i32 = arith.constant 0 : i32
    %c0_i32_0 = arith.constant 0 : i32
    %c0_i32_1 = arith.constant 0 : i32
    return %c0_i32, %c0_i32_0 : i32, i32
  }
  func.func @transform_7(%arg0: i32) -> (i32, i32) {
    %c0_i32 = arith.constant 0 : i32
    %c0_i32_0 = arith.constant 0 : i32
    %c0_i32_1 = arith.constant 0 : i32
    return %c0_i32, %c0_i32_0 : i32, i32
  }
  func.func @transform_8(%arg0: i32) -> (i32, i32) {
    %c0_i32 = arith.constant 0 : i32
    %c0_i32_0 = arith.constant 0 : i32
    %c0_i32_1 = arith.constant 0 : i32
    return %c0_i32, %c0_i32_0 : i32, i32
  }
  func.func @transform_9(%arg0: i32) -> (i32, i32) {
    %c0_i32 = arith.constant 0 : i32
    %c0_i32_0 = arith.constant 0 : i32
    %c0_i32_1 = arith.constant 0 : i32
    return %c0_i32, %c0_i32_0 : i32, i32
  }
  func.func @transform_10(%arg0: i32) -> (i32, i32) {
    %c0_i32 = arith.constant 0 : i32
    %c0_i32_0 = arith.constant 0 : i32
    return %arg0, %c0_i32 : i32, i32
  }
}

</mosaic_0001>

<bundles_post_ra>
// kernel: tpu_custom_call.1
= control target key start
LH: loop header
LB: loop body
LE: loop exit
PB: predicated region body
PF: predicated region fallthrough
CT: control target
= control target key end

     0   :  { %15 = vsyncpa [#allocation3], 0  ;;  %s1042_s0 = inlined_call_operand.vmem [shape: f32[4,128], index: 0, kind: input, shape index: {}]   ;;  %s1043_s1 = inlined_call_operand.hbm [shape: f32[4,128], index: 1, kind: input, shape index: {}]   ;;  %s1044_s2 = inlined_call_operand.vmem [shape: f32[4,4], index: 2, kind: input, shape index: {}]   ;;  %s1045_s3 = inlined_call_operand.hbm [shape: f32[2,128], index: 3, kind: input, shape index: {}]   ;;  %s1046_s4 = inlined_call_operand.vmem [shape: f32[4,2], index: 4, kind: input, shape index: {}]   ;;  %s1047_s5 = inlined_call_operand.hbm [shape: f32[128,128], index: 5, kind: input, shape index: {}]   ;;  %s1048_s6 = inlined_call_operand.hbm [shape: f32[128,128], index: 6, kind: input, shape index: {}]   ;;  %s1049_s7 = inlined_call_operand.vmem [shape: f32[1,128], index: 7, kind: input, shape index: {}]   ;;  %s1050_s8 = inlined_call_operand.vmem [shape: f32[4,128], index: 8, kind: input, shape index: {}]   ;;  %s1051_s9 = inlined_call_operand.hbm [shape: f32[128,128], index: 9, kind: input, shape index: {}]   ;;  %s1052_s10 = inlined_call_operand.hbm [shape: f32[4,128], index: 10, kind: output, shape index: {}]  }
   0x1   :  { %16 = vsyncpa [#allocation6], 0 }
   0x2   :  { %17 = vsyncpa [#allocation9], 0 }
   0x3   :  { %18 = vsyncpa [#allocation4], 0  ;;  %s870_s13 = smov [#allocation5]  }
   0x4   :  { %s39_s14 = sshll.u32 %s870_s13, 4  ;;  %s40_s14 = int_to_ptr.vmem [resolvable:$true] %s39_s14 }
   0x5   :  { %s750_s15 = scalar_lea.vmem %s40_s14, 32  ;;  %p755_p1 = scmp.lt.s32.totalorder %s40_s14, %s40_s14 }
   0x6   :  { %p751_p0 = scmp.ne.s32.totalorder %s40_s14, %s750_s15  ;;  %p756_p2 = scmp.lt.s32.totalorder %s750_s15, %s750_s15 }
   0x8   :  { %p757_p3 = por %p756_p2, %p755_p1 }
   0xa   :  { %p758_p4 = pnand %p757_p3, %p751_p0 }
   0xc   :  { %761 = shalt.err (!%p758_p4)
}
   0xd   :  { %42 = dma.hbm_to_vmem [thread:$0]  %s1045_s3, 32, %s40_s14, [#allocation6]  }
   0xe   :  { %s871_s18 = smov [#allocation8]   ;;  %s872_s20 = smov [#allocation2]  }
   0xf   :  { %s62_s19 = sshll.u32 %s871_s18, 4  ;;  %s27_s21 = sshll.u32 %s872_s20, 4  ;;  %s63_s19 = int_to_ptr.vmem [resolvable:$true] %s62_s19  ;;  %s28_s21 = int_to_ptr.vmem [resolvable:$true] %s27_s21 }
  0x10   :  { %s770_s22 = scalar_lea.vmem %s63_s19, 2048  ;;  %p775_p6 = scmp.lt.s32.totalorder %s63_s19, %s63_s19 }
  0x11   :  { %p771_p5 = scmp.ne.s32.totalorder %s63_s19, %s770_s22  ;;  %p776_p7 = scmp.lt.s32.totalorder %s770_s22, %s770_s22 }
  0x13   :  { %p777_p8 = por %p776_p7, %p775_p6 }
  0x15   :  { %p778_p9 = pnand %p777_p8, %p771_p5 }
  0x17   :  { %781 = shalt.err (!%p778_p9)
}
  0x18   :  { %s873_s23 = smov 128   ;;  %s874_s24 = smov 8  }
  0x19   :  { %68 = dma.hbm_to_vmem [thread:$0]  %s1048_s6, 2048, %s63_s19, [#allocation9], %s873_s23, %s873_s23, %s874_s24  }
  0x1a   :  { %s790_s3 = scalar_lea.vmem %s28_s21, 64  ;;  %p795_p11 = scmp.lt.s32.totalorder %s28_s21, %s28_s21 }
  0x1b   :  { %p791_p10 = scmp.ne.s32.totalorder %s28_s21, %s790_s3  ;;  %p796_p12 = scmp.lt.s32.totalorder %s790_s3, %s790_s3 }
  0x1d   :  { %p797_p13 = por %p796_p12, %p795_p11 }
  0x1f   :  { %p798_p0 = pnand %p797_p13, %p791_p10 }
  0x21   :  { %801 = shalt.err (!%p798_p0)
}
  0x22   :  { %30 = dma.hbm_to_vmem [thread:$0]  %s1043_s1, 64, %s28_s21, [#allocation3]  }
  0x23   :  { %s875_s29 = smov [#allocation7]   ;;  %s876_s11 = smov [#allocation10]  }
  0x24   :  { %s50_s30 = sshll.u32 %s875_s29, 4  ;;  %s78_s12 = sshll.u32 %s876_s11, 4  ;;  %s51_s30 = int_to_ptr.vmem [resolvable:$true] %s50_s30  ;;  %s79_s12 = int_to_ptr.vmem [resolvable:$true] %s78_s12 }
  0x25   :  { %s810_s13 = scalar_lea.vmem %s51_s30, 2048  ;;  %p815_p2 = scmp.lt.s32.totalorder %s51_s30, %s51_s30 }
  0x26   :  { %p811_p1 = scmp.ne.s32.totalorder %s51_s30, %s810_s13  ;;  %p816_p3 = scmp.lt.s32.totalorder %s810_s13, %s810_s13 }
  0x28   :  { %p817_p4 = por %p816_p3, %p815_p2 }
  0x2a   :  { %p818_p5 = pnand %p817_p4, %p811_p1 }
  0x2c   :  { %821 = shalt.err (!%p818_p5)
}
  0x2d   :  { %56 = dma.hbm_to_vmem [thread:$0]  %s1047_s5, 2048, %s51_s30, [#allocation6], %s873_s23, %s873_s23, %s874_s24  }
  0x2e   :  { %s830_s1 = scalar_lea.vmem %s79_s12, 2048  ;;  %p835_p7 = scmp.lt.s32.totalorder %s79_s12, %s79_s12 }
  0x2f   :  { %p831_p6 = scmp.ne.s32.totalorder %s79_s12, %s830_s1  ;;  %p836_p8 = scmp.lt.s32.totalorder %s830_s1, %s830_s1 }
  0x31   :  { %p837_p9 = por %p836_p8, %p835_p7 }
  0x33   :  { %p838_p10 = pnand %p837_p9, %p831_p6 }
  0x35   :  { %841 = shalt.err (!%p838_p10)
}
  0x36   :  { %84 = dma.hbm_to_vmem [thread:$0]  %s1051_s9, 2048, %s79_s12, [#allocation9], %s873_s23, %s873_s23, %s874_s24  }
  0x37   :  { %862 = dma.done.wait [#allocation3], 64  }
  0x38   :  { %863 = vsyncadd [#allocation3], 4294967232 }
  0x39   :  { %864 = dma.done.wait [#allocation6], 2080  }
  0x3a   :  { %865 = vsyncadd [#allocation6], 4294965216 }
  0x3b   :  { %866 = dma.done.wait [#allocation9], 4096  }
  0x3c   :  { %867 = vsyncadd [#allocation9], 4294963200  ;;  %v877_v0 = vmov 0.0   ;;  %vm878_vm0 = vmmov 0   ;;  %v117_v1 = vld [vmem:[#allocation7 + $0x78] sm:$0xff]  ;;  %v116_v3 = vld [vmem:[#allocation7 + $0x70] sm:$0xff] }
  0x3d   :  { %650 = vmatprep.subr.mxu1 %v877_v0  ;;  %615 = vmatprep.subr.mxu0 %v877_v0  ;;  %v133_v2 = vld [vmem:[#allocation8 + $0x78] sm:$0xff]  ;;  %v132_v4 = vld [vmem:[#allocation8 + $0x70] sm:$0xff]  ;;  %v115_v5 = vld [vmem:[#allocation7 + $0x68] sm:$0xff]  ;;  %vm280_vm1 = vcmask 1041408   ;;  %vm276_vm2 = vcmask 15360   ;;  %vm371_vm3 = vcmask 1043456  }
  0x3e   :  { %682 = vmatprep.mubr.msk.f32.mxu1 %vm878_vm0, %v877_v0  ;;  %647 = vmatprep.mubr.msk.f32.mxu0 %vm878_vm0, %v877_v0  ;;  %v131_v6 = vld [vmem:[#allocation8 + $0x68] sm:$0xff]  ;;  %v114_v7 = vld [vmem:[#allocation7 + $0x60] sm:$0xff]  ;;  %v113_v9 = vld [vmem:[#allocation7 + $0x58] sm:$0xff]  ;;  %vm367_vm4 = vcmask 31744   ;;  %s879_s21 = smov [#allocation11]  }
  0x3f   :  { %651 = vmatpush3.msra.mxu1 %v117_v1  ;;  %616 = vmatpush3.msra.mxu0 %v133_v2  ;;  %v130_v8 = vld [vmem:[#allocation8 + $0x60] sm:$0xff]  ;;  %v129_v10 = vld [vmem:[#allocation8 + $0x58] sm:$0xff]  ;;  %v112_v11 = vld [vmem:[#allocation7 + $0x50] sm:$0xff]  ;;  %s544_s22 = sshll.u32 %s879_s21, 4  ;;  %s545_s22 = int_to_ptr.vmem [resolvable:$true] %s544_s22 }
  0x40   :  { %652 = vmatprep.subr.mxu1 %v877_v0  ;;  %617 = vmatprep.subr.mxu0 %v877_v0  ;;  %v128_v12 = vld [vmem:[#allocation8 + $0x50] sm:$0xff]  ;;  %v111_v13 = vld [vmem:[#allocation7 + $0x48] sm:$0xff]  ;;  %v110_v15 = vld [vmem:[#allocation7 + $0x40] sm:$0xff]  ;;  %p847_p12 = scmp.lt.s32.totalorder %s545_s22, %s545_s22 }
  0x41   :  { %653 = vmatpush3.msra.mxu1 %v116_v3  ;;  %618 = vmatpush3.msra.mxu0 %v132_v4  ;;  %v127_v14 = vld [vmem:[#allocation8 + $0x48] sm:$0xff]  ;;  %v126_v16 = vld [vmem:[#allocation8 + $0x40] sm:$0xff]  ;;  %v109_v17 = vld [vmem:[#allocation7 + $0x38] sm:$0xff] }
  0x42   :  { %654 = vmatprep.subr.mxu1 %v877_v0  ;;  %619 = vmatprep.subr.mxu0 %v877_v0  ;;  %v125_v18 = vld [vmem:[#allocation8 + $0x38] sm:$0xff]  ;;  %v108_v19 = vld [vmem:[#allocation7 + $0x30] sm:$0xff]  ;;  %v107_v21 = vld [vmem:[#allocation7 + $0x28] sm:$0xff] }
  0x43   :  { %655 = vmatpush3.msra.mxu1 %v115_v5  ;;  %620 = vmatpush3.msra.mxu0 %v131_v6  ;;  %v124_v20 = vld [vmem:[#allocation8 + $0x30] sm:$0xff]  ;;  %v123_v22 = vld [vmem:[#allocation8 + $0x28] sm:$0xff]  ;;  %v106_v23 = vld [vmem:[#allocation7 + $0x20] sm:$0xff] }
  0x44   :  { %656 = vmatprep.subr.mxu1 %v877_v0  ;;  %621 = vmatprep.subr.mxu0 %v877_v0  ;;  %v122_v24 = vld [vmem:[#allocation8 + $0x20] sm:$0xff]  ;;  %v105_v25 = vld [vmem:[#allocation7 + $0x18] sm:$0xff]  ;;  %v104_v27 = vld [vmem:[#allocation7 + $0x10] sm:$0xff] }
  0x45   :  { %657 = vmatpush3.msra.mxu1 %v114_v7  ;;  %622 = vmatpush3.msra.mxu0 %v130_v8  ;;  %v121_v26 = vld [vmem:[#allocation8 + $0x18] sm:$0xff]  ;;  %v120_v28 = vld [vmem:[#allocation8 + $0x10] sm:$0xff]  ;;  %v103_v29 = vld [vmem:[#allocation7 + $0x8] sm:$0xff] }
  0x46   :  { %658 = vmatprep.subr.mxu1 %v877_v0  ;;  %623 = vmatprep.subr.mxu0 %v877_v0  ;;  %v119_v30 = vld [vmem:[#allocation8 + $0x8] sm:$0xff]  ;;  %v102_v31 = vld [vmem:[#allocation7] sm:$0xff]  ;;  %v996_v33 = vld [vmem:[%s1042_s0] sm:$0xf] }
  0x47   :  { %659 = vmatpush3.msra.mxu1 %v113_v9  ;;  %624 = vmatpush3.msra.mxu0 %v129_v10  ;;  %v118_v32 = vld [vmem:[#allocation8] sm:$0xff]  ;;  %v101_v34 = vld [vmem:[#allocation2] sm:$0xf]  ;;  %v275_v35 = vld [vmem:[#allocation5] sm:$0x3] }
  0x48   :  { %660 = vmatprep.subr.mxu1 %v877_v0  ;;  %625 = vmatprep.subr.mxu0 %v877_v0  ;;  %v274_v36 = vld [vmem:[%s1046_s4] sm:$0xf]  ;;  %v463_v39 = vld [vmem:[#allocation10 + $0x70] sm:$0xff]  ;;  %v462_v41 = vld [vmem:[#allocation10 + $0x68] sm:$0xff] }
  0x49   :  { %661 = vmatpush3.msra.mxu1 %v112_v11  ;;  %626 = vmatpush3.msra.mxu0 %v128_v12  ;;  %v464_v37 = vld [vmem:[#allocation10 + $0x78] sm:$0xff]  ;;  %v461_v42 = vld [vmem:[#allocation10 + $0x60] sm:$0xff]  ;;  %v459_v44 = vld [vmem:[#allocation10 + $0x50] sm:$0xff] }
  0x4a   :  { %662 = vmatprep.subr.mxu1 %v877_v0  ;;  %627 = vmatprep.subr.mxu0 %v877_v0  ;;  %v366_v38 = vld [vmem:[%s1050_s8] sm:$0xf]  ;;  %v458_v45 = vld [vmem:[#allocation10 + $0x48] sm:$0xff]  ;;  %v457_v46 = vld [vmem:[#allocation10 + $0x40] sm:$0xff] }
  0x4b   :  { %663 = vmatpush3.msra.mxu1 %v111_v13  ;;  %628 = vmatpush3.msra.mxu0 %v127_v14  ;;  %v365_v40 = vld [vmem:[%s1044_s2] sm:$0xf]  ;;  %v455_v48 = vld [vmem:[#allocation10 + $0x30] sm:$0xff]  ;;  %v454_v49 = vld [vmem:[#allocation10 + $0x28] sm:$0xff] }
  0x4c   :  { %664 = vmatprep.subr.mxu1 %v877_v0  ;;  %629 = vmatprep.subr.mxu0 %v877_v0  ;;  %v460_v43 = vld [vmem:[#allocation10 + $0x58] sm:$0xff]  ;;  %v453_v50 = vld [vmem:[#allocation10 + $0x20] sm:$0xff]  ;;  %v451_v52 = vld [vmem:[#allocation10 + $0x10] sm:$0xff] }
  0x4d   :  { %665 = vmatpush3.msra.mxu1 %v110_v15  ;;  %630 = vmatpush3.msra.mxu0 %v126_v16  ;;  %v456_v47 = vld [vmem:[#allocation10 + $0x38] sm:$0xff]  ;;  %v450_v53 = vld [vmem:[#allocation10 + $0x8] sm:$0xff]  ;;  %v449_v54 = vld [vmem:[#allocation10] sm:$0xff] }
  0x4e   :  { %666 = vmatprep.subr.mxu1 %v877_v0  ;;  %631 = vmatprep.subr.mxu0 %v877_v0  ;;  %v452_v51 = vld [vmem:[#allocation10 + $0x18] sm:$0xff] }
  0x4f   :  { %667 = vmatpush3.msra.mxu1 %v109_v17  ;;  %632 = vmatpush3.msra.mxu0 %v125_v18  ;;  %v557_v61 = vld [vmem:[%s1049_s7] ss:$0 sm:$0xff]  ;;  %s842_s7 = scalar_lea.vmem %s545_s22, 64 }
  0x50   :  { %668 = vmatprep.subr.mxu1 %v877_v0  ;;  %633 = vmatprep.subr.mxu0 %v877_v0  ;;  %p843_p11 = scmp.ne.s32.totalorder %s545_s22, %s842_s7  ;;  %p848_p13 = scmp.lt.s32.totalorder %s842_s7, %s842_s7 }
  0x51   :  { %669 = vmatpush3.msra.mxu1 %v108_v19  ;;  %634 = vmatpush3.msra.mxu0 %v124_v20 }
  0x52   :  { %670 = vmatprep.subr.mxu1 %v877_v0  ;;  %635 = vmatprep.subr.mxu0 %v877_v0  ;;  %p849_p0 = por %p848_p13, %p847_p12 }
  0x53   :  { %671 = vmatpush3.msra.mxu1 %v107_v21  ;;  %636 = vmatpush3.msra.mxu0 %v123_v22 }
  0x54   :  { %672 = vmatprep.subr.mxu1 %v877_v0  ;;  %637 = vmatprep.subr.mxu0 %v877_v0  ;;  %p850_p1 = pnand %p849_p0, %p843_p11 }
  0x55   :  { %673 = vmatpush3.msra.mxu1 %v106_v23  ;;  %638 = vmatpush3.msra.mxu0 %v122_v24 }
  0x56   :  { %674 = vmatprep.subr.mxu1 %v877_v0  ;;  %639 = vmatprep.subr.mxu0 %v877_v0 }
  0x57   :  { %675 = vmatpush3.msra.mxu1 %v105_v25  ;;  %640 = vmatpush3.msra.mxu0 %v121_v26 }
  0x58   :  { %676 = vmatprep.subr.mxu1 %v877_v0  ;;  %641 = vmatprep.subr.mxu0 %v877_v0 }
  0x59   :  { %677 = vmatpush3.msra.mxu1 %v104_v27  ;;  %642 = vmatpush3.msra.mxu0 %v120_v28 }
  0x5a   :  { %678 = vmatprep.subr.mxu1 %v877_v0  ;;  %643 = vmatprep.subr.mxu0 %v877_v0 }
  0x5b   :  { %679 = vmatpush3.msra.mxu1 %v103_v29  ;;  %644 = vmatpush3.msra.mxu0 %v119_v30 }
  0x5c   :  { %680 = vmatprep.subr.mxu1 %v877_v0  ;;  %645 = vmatprep.subr.mxu0 %v877_v0 }
  0x5d   :  { %681 = vmatpush3.msra.mxu1 %v102_v31  ;;  %646 = vmatpush3.msra.mxu0 %v118_v32 }
  0x5e   :  { %683 = vmatmul.mubr.f32.vlgmr.msra.gmra.mxu1 %v996_v33  ;;  %685 = vmatprep.subr.mxu1 %v877_v0 }
  0x5f   :  { %648 = vmatmul.mubr.f32.vlgmr.msra.gmra.mxu0 %v101_v34  ;;  %686 = vmatpush3.msk.msra.mxu1 %vm280_vm1, %v275_v35 }
  0x60   :  { %687 = vmatprep.mubr.msk.f32.mxu1 %vm878_vm0, %v877_v0  ;;  %690 = vmatprep.subr.mxu1 %v877_v0 }
  0x61   :  { %695 = vmatprep.subr.mxu0 %v877_v0  ;;  %727 = vmatprep.mubr.msk.f32.mxu0 %vm878_vm0, %v877_v0 }
  0x62   :  { %688 = vmatmul.mubr.msk.f32.vlgmr.msra.gmra.mxu1 %vm276_vm2, %v274_v36  ;;  %696 = vmatpush3.msra.mxu0 %v464_v37 }
  0x63   :  { %691 = vmatpush3.msk.msra.mxu1 %vm371_vm3, %v366_v38  ;;  %692 = vmatprep.mubr.msk.f32.mxu1 %vm878_vm0, %v877_v0 }
  0x64   :  { %697 = vmatprep.subr.mxu0 %v877_v0 }
  0x65   :  { %698 = vmatpush3.msra.mxu0 %v463_v39 }
  0x66   :  { %693 = vmatmul.mubr.msk.f32.vlgmr.msra.gmra.mxu1 %vm367_vm4, %v365_v40  ;;  %699 = vmatprep.subr.mxu0 %v877_v0 }
  0x67   :  { %700 = vmatpush3.msra.mxu0 %v462_v41 }
  0x68   :  { %701 = vmatprep.subr.mxu0 %v877_v0 }
  0x69   :  { %702 = vmatpush3.msra.mxu0 %v461_v42 }
  0x6a   :  { %703 = vmatprep.subr.mxu0 %v877_v0 }
  0x6b   :  { %704 = vmatpush3.msra.mxu0 %v460_v43 }
  0x6c   :  { %705 = vmatprep.subr.mxu0 %v877_v0 }
  0x6d   :  { %706 = vmatpush3.msra.mxu0 %v459_v44 }
  0x6e   :  { %707 = vmatprep.subr.mxu0 %v877_v0 }
  0x6f   :  { %708 = vmatpush3.msra.mxu0 %v458_v45 }
  0x70   :  { %709 = vmatprep.subr.mxu0 %v877_v0 }
  0x71   :  { %710 = vmatpush3.msra.mxu0 %v457_v46 }
  0x72   :  { %711 = vmatprep.subr.mxu0 %v877_v0 }
  0x73   :  { %712 = vmatpush3.msra.mxu0 %v456_v47 }
  0x74   :  { %713 = vmatprep.subr.mxu0 %v877_v0 }
  0x75   :  { %714 = vmatpush3.msra.mxu0 %v455_v48 }
  0x76   :  { %715 = vmatprep.subr.mxu0 %v877_v0 }
  0x77   :  { %716 = vmatpush3.msra.mxu0 %v454_v49 }
  0x78   :  { %717 = vmatprep.subr.mxu0 %v877_v0 }
  0x79   :  { %718 = vmatpush3.msra.mxu0 %v453_v50 }
  0x7a   :  { %719 = vmatprep.subr.mxu0 %v877_v0 }
  0x7b   :  { %720 = vmatpush3.msra.mxu0 %v452_v51 }
  0x7c   :  { %721 = vmatprep.subr.mxu0 %v877_v0 }
  0x7d   :  { %722 = vmatpush3.msra.mxu0 %v451_v52 }
  0x7e   :  { %723 = vmatprep.subr.mxu0 %v877_v0 }
  0x7f   :  { %724 = vmatpush3.msra.mxu0 %v450_v53 }
  0x80   :  { %725 = vmatprep.subr.mxu0 %v877_v0 }
  0x81   :  { %726 = vmatpush3.msra.mxu0 %v449_v54 }
 0x11e   :  { %v270_v55 = vpop.f32.mrf.mxu1 }
 0x11f   :  { %v200_v56 = vpop.f32.mrf.mxu0 }
 0x120   :  { %v684_v57 = vpop.f32.mrf.mxu1  ;;  %v271_v58 = vadd.f32 %v270_v55, %v200_v56 }
 0x121   :  { %v649_v59 = vpop.f32.mrf.mxu0 }
 0x122   :  { %v350_v60 = vpop.f32.mrf.mxu1 }
 0x123   :  { %v354_v62 = vadd.f32 %v350_v60, %v271_v58 }
 0x124   :  { %v689_v63 = vpop.f32.mrf.mxu1 }
 0x125   :  { %vm356_vm5 = vcmp.ge.f32.partialorder %v354_v62, 0.0  ;;  %v363_v1 = vmul.f32 %v557_v61, %v354_v62 }
 0x126   :  { %v441_v2 = vpop.f32.mrf.mxu1 }
 0x127   :  { %v364_v3 = vsel %vm356_vm5, %v354_v62, %v363_v1 }
 0x128   :  { %v445_v4 = vsub.f32 %v364_v3, %v996_v33  ;;  %v694_v0 = vpop.f32.mrf.mxu1 }
 0x12a   :  { %v446_v5 = vmul.f32 %v445_v4, %v441_v2 }
 0x12c   :  { %v447_v6 = vadd.f32 %v446_v5, %v996_v33 }
 0x12e   :  { %v448_v7 = vmul.f32 %v447_v6, %v447_v6 }
 0x130   :  { %728 = vmatmul.mubr.f32.vlgmr.msra.gmra.mxu0 %v448_v7 }
 0x1f0   :  { %v531_v8 = vpop.f32.mrf.mxu0 }
 0x1f1   :  { %740 = vrsqrt.f32 %v531_v8 }
 0x1f2   :  { %v729_v9 = vpop.f32.mrf.mxu0 }
 0x1fe   :  { %v741_v10 = vpop.eup %740 }
 0x1ff   :  { %v536_v11 = vmul.f32 %v741_v10, %v447_v6 }
 0x201   :  { %537 = vst [vmem:[#allocation11] sm:$0xf] %v536_v11 }
 0x202   :  { %853 = shalt.err (!%p850_p1)
}
 0x203   :  { %547 = dma.vmem_to_hbm [thread:$0]  %s545_s22, 64, %s1052_s10, [#allocation4]  }
 0x204   :  { %868 = dma.done.wait [#allocation4], 64  }
 0x205   :  { %869 = vsyncadd [#allocation4], 4294967232 }
 0x206   :  { %551 = vsyncpa [#allocation3], 1 }
 0x207   :  { %552 = vsyncpa [#allocation6], 1 }
 0x208   :  { %553 = vsyncpa [#allocation9], 1 }
 0x209   :  { %554 = vsyncpa [#allocation4], 1 }

</bundles_post_ra>
